<compile_context>
chip_gen: v7x
topology: tpu7x:2x2x1
jax: 0.10.0
libtpu: 0.0.40
codegen_flags: <defaults>
</compile_context>

<pallas_src>
import functools

import jax
import jax.numpy as jnp
from jax.experimental import pallas as pl
from jax.experimental.pallas import tpu as pltpu


def _vhd_kernel(mask_ref, x_ref, o_ref):
    # mask_ref: (tR, 1) f32; x_ref / o_ref: (tR, tL). Lane-broadcast multiply.
    o_ref[...] = (x_ref[...] * mask_ref[...]).astype(o_ref.dtype)


def _round_up(n, m):
    return ((n + m - 1) // m) * m


def _balance(total, tile, quantum):
    """Shrink `tile` so the final block is not a thin remainder (keeps multiple of quantum)."""
    if tile >= total:
        return total
    n_blocks = -(-total // tile)
    balanced = _round_up(-(-total // n_blocks), quantum)
    return min(tile, balanced)


def _vmem_budget():
    """(per-x-tile byte cap, vmem_limit_bytes), generation aware."""
    tile_cap = 6 * 1024 * 1024          # safe on 64 MiB VMEM (v7x)
    vmem_limit = 48 * 1024 * 1024
    try:
        cap = pltpu.get_tpu_info().vmem_capacity_bytes
        if cap is not None and cap > 64 * 1024 * 1024:   # v5e / v6e (128 MiB)
            tile_cap = 8 * 1024 * 1024
            vmem_limit = 64 * 1024 * 1024
    except Exception:
        pass
    return tile_cap, vmem_limit


def _pick_tiles(rows, seq, itemsize, tile_cap_bytes):
    """Choose (tR, tL): lane-dense, sublane-packed, x-tile <= tile_cap_bytes."""
    sub = max(8, 32 // itemsize)          # sublane pack: 8 f32, 16 bf16, 32 int8
    lane = 128
    mask_row_bytes = lane * 4             # (tR, 1) f32 mask pads to 128 lanes in VMEM

    # 1) Lane tile as wide as the budget allows at the minimum row count.
    max_lanes = max(lane, (tile_cap_bytes // (sub * itemsize)) // lane * lane)
    t_l = seq if seq <= max_lanes else max_lanes

    # 2) Row tile from the remaining budget (mask column included).
    per_row_bytes = t_l * itemsize + mask_row_bytes
    max_rows = max(sub, (tile_cap_bytes // per_row_bytes) // sub * sub)
    t_r = rows if rows <= max_rows else max_rows

    # 3) If all rows fit in one row tile, re-expand the lane tile to fill the budget.
    if t_r >= rows and t_l < seq:
        rows_p = _round_up(rows, sub)
        budget_lanes = (tile_cap_bytes - rows_p * mask_row_bytes) // (rows_p * itemsize)
        budget_lanes = max(lane, budget_lanes // lane * lane)
        t_l = seq if seq <= budget_lanes else budget_lanes

    # 4) Balance tiles so the trailing block is not a thin remainder.
    if t_r < rows:
        t_r = _balance(rows, t_r, sub)
    if t_l < seq:
        t_l = _balance(seq, t_l, lane)

    # 5) Guarantee >= 2 blocks when possible so the parallel grid can shard
    #    across both TensorCores on v7x megacore.
    if t_r >= rows and t_l >= seq:
        if rows > sub:
            t_r = _round_up(-(-rows // 2), sub)
        elif seq > lane:
            t_l = _round_up(-(-seq // 2), lane)

    return t_r, t_l


@functools.partial(jax.jit, static_argnames=("training", "vhdrop"))
def variational_hid_dropout(x, mask, *, training=True, vhdrop=0.0):
    """Applies a per-(batch, channel) dropout mask, broadcast over the sequence dim.

    x:    (B, C, L) array
    mask: (B, C, 1) array (already scaled by 1/(1 - vhdrop))
    """
    if (not training) or vhdrop == 0.0:
        return x

    B, C, L = x.shape
    assert mask.shape == (B, C, 1)

    m_f32 = mask.astype(jnp.float32)

    # Small-L fallback: last dim < 128 would force masked lane stores and the
    # fixed launch/pipeline overhead exceeds the work — let XLA do it.
    if L < 128:
        return (x * m_f32).astype(x.dtype)

    rows = B * C
    itemsize = jnp.dtype(x.dtype).itemsize
    tile_cap, vmem_limit = _vmem_budget()
    t_r, t_l = _pick_tiles(rows, L, itemsize, tile_cap)

    x2 = x.reshape(rows, L)
    m2 = m_f32.reshape(rows, 1)

    grid = (pl.cdiv(rows, t_r), pl.cdiv(L, t_l))

    cost = pl.CostEstimate(
        flops=rows * L,
        transcendentals=0,
        bytes_accessed=2 * rows * L * itemsize + rows * 4,
    )

    out2 = pl.pallas_call(
        _vhd_kernel,
        out_shape=jax.ShapeDtypeStruct((rows, L), x.dtype),
        grid_spec=pltpu.PrefetchScalarGridSpec(
            num_scalar_prefetch=0,
            grid=grid,
            in_specs=[
                # Mask block is invariant in the (innermost) L axis, so Pallas
                # does not re-fetch it between consecutive L steps.
                pl.BlockSpec((t_r, 1), lambda r, l: (r, 0)),
                pl.BlockSpec((t_r, t_l), lambda r, l: (r, l)),
            ],
            out_specs=pl.BlockSpec((t_r, t_l), lambda r, l: (r, l)),
        ),
        compiler_params=pltpu.CompilerParams(
            # No reduction axis: every (r, l) block is independent.
            dimension_semantics=("parallel", "parallel"),
            vmem_limit_bytes=vmem_limit,
        ),
        cost_estimate=cost,
    )(m2, x2)

    return out2.reshape(B, C, L)


def reset_mask(key, x, vhdrop):
    """Mirrors VariationalHidDropout.reset_mask with keep-prob = 1 - vhdrop:
       keep ~ Bernoulli(1 - vhdrop), mask = keep / (1 - vhdrop)  (E[mask] = 1).
       Mask is kept in f32 (the kernel multiplies in f32 and casts once)."""
    B, C, _ = x.shape
    keep = jax.random.bernoulli(key, p=1.0 - vhdrop, shape=(B, C, 1))
    return keep.astype(jnp.float32) * jnp.float32(1.0 / (1.0 - vhdrop))


if __name__ == "__main__":
    key = jax.random.PRNGKey(0)
    kx, km = jax.random.split(key)

    B, C, L = 2, 4, 256
    vhdrop = 0.25

    x = jax.random.normal(kx, (B, C, L), dtype=jnp.float32)
    mask = reset_mask(km, x, vhdrop)

    # Training path (Pallas kernel).
    y = variational_hid_dropout(x, mask, training=True, vhdrop=vhdrop)
    y = jax.block_until_ready(y)
    ref = (x * mask).astype(x.dtype)
    assert y.shape == x.shape and y.dtype == x.dtype
    assert jnp.allclose(y, ref, atol=1e-6, rtol=1e-6)

    # Small-L path (L < 128 -> plain XLA fallback, avoids masked lane stores).
    x_s = jax.random.normal(kx, (B, C, 16), dtype=jnp.float32)
    m_s = reset_mask(km, x_s, vhdrop)
    y_s = jax.block_until_ready(
        variational_hid_dropout(x_s, m_s, training=True, vhdrop=vhdrop))
    assert jnp.allclose(y_s, (x_s * m_s).astype(x_s.dtype), atol=1e-6, rtol=1e-6)

    # Eval path (identity, no kernel).
    y_eval = jax.block_until_ready(
        variational_hid_dropout(x, mask, training=False, vhdrop=vhdrop))
    assert jnp.array_equal(y_eval, x)

    print("KERNEL_OK")
</pallas_src>

<mosaic_0001>
module attributes {stable_mosaic.version = 11 : i64} {
  func.func @_vhd_kernel(%arg0: i32, %arg1: i32, %arg2: memref<8x1xf32, #tpu.memory_space<vmem>>, %arg3: memref<8x128xf32, #tpu.memory_space<vmem>>, %arg4: memref<8x128xf32, #tpu.memory_space<vmem>>) attributes {dimension_semantics = [#tpu.dimension_semantics<parallel>, #tpu.dimension_semantics<parallel>], iteration_bounds = array<i64: 1, 2>, scalar_prefetch = 0 : i64, scratch_operands = 0 : i64, tpu.core_type = #tpu.core_type<tc>, window_params = [{transform_indices = @transform_0, window_bounds = array<i64: 8, 1>}, {transform_indices = @transform_1, window_bounds = array<i64: 8, 128>}, {transform_indices = @transform_2, window_bounds = array<i64: 8, 128>}]} {
    %c0 = arith.constant 0 : index
    %c0_0 = arith.constant 0 : index
    %0 = vector.load %arg3[%c0, %c0_0] : memref<8x128xf32, #tpu.memory_space<vmem>>, vector<8x128xf32>
    %c0_1 = arith.constant 0 : index
    %c0_2 = arith.constant 0 : index
    %1 = vector.load %arg2[%c0_1, %c0_2] : memref<8x1xf32, #tpu.memory_space<vmem>>, vector<8x1xf32>
    %2 = vector.broadcast %1 : vector<8x1xf32> to vector<8x128xf32>
    %3 = arith.mulf %0, %2 : vector<8x128xf32>
    %c0_3 = arith.constant 0 : index
    %c0_4 = arith.constant 0 : index
    %4 = vector.load %arg4[%c0_3, %c0_4] : memref<8x128xf32, #tpu.memory_space<vmem>>, vector<8x128xf32>
    tpu.vector_store %arg4[%c0_3, %c0_4], %3 {strides = array<i32>} : memref<8x128xf32, #tpu.memory_space<vmem>>, vector<8x128xf32>,
    return
  }
  func.func @transform_0(%arg0: i32, %arg1: i32) -> (i32, i32) {
    %c0_i32 = arith.constant 0 : i32
    %c0_i32_0 = arith.constant 0 : i32
    return %arg0, %c0_i32 : i32, i32
  }
  func.func @transform_1(%arg0: i32, %arg1: i32) -> (i32, i32) {
    %c0_i32 = arith.constant 0 : i32
    return %arg0, %arg1 : i32, i32
  }
  func.func @transform_2(%arg0: i32, %arg1: i32) -> (i32, i32) {
    %c0_i32 = arith.constant 0 : i32
    return %arg0, %arg1 : i32, i32
  }
}

</mosaic_0001>

<bundles_post_ra>
// kernel: variational_hid_dropout.1
= control target key start
LH: loop header
LB: loop body
LE: loop exit
PB: predicated region body
PF: predicated region fallthrough
CT: control target
= control target key end

     0   :  { %s376_s9 = smov 0   ;;  %s378_s10 = smov 0   ;;  %s400_s0 = inlined_call_operand.vmem [shape: f32[8,1], index: 0, kind: input, shape index: {}]   ;;  %s401_s1 = inlined_call_operand.vmem [shape: f32[8,256], index: 1, kind: input, shape index: {}]   ;;  %s402_s2 = inlined_call_operand.vmem [shape: f32[8,256], index: 2, kind: output, shape index: {}]  }
   0x1   :  { %s380_s11 = smov 0  }
   0x2 LB: > { %s21_s12 = sadd.s32 1, %s354_s10  ;;  %p305_p0 = scmp.ge.s32.totalorder %s358_s11, 1  ;;  %s358_s11 = sphi %s380_s11, %s12_s11   ;;  %s354_s10 = sphi %s378_s10, %s404_s10   ;;  %s350_s9 = sphi %s376_s9, %s403_s9  }
   0x3   : > { %p22_p1 = scmp.ge.s32.totalorder %s21_s12, 2  ;;  %p140_p2 = scmp.lt.s32.totalorder %s358_s11, 3 }
   0x5   : > { %s406_s12 = smov (%p22_p1, %s21_s12), 0  ;;  %p141_p3 = pnand %p305_p0, %p140_p2 }
   0x6   : > { %v193_v0 = vld [vmem:[%s400_s0] sm:$0xff] (!%p141_p3)  ;;  %v360_v1 = vmov (!%p141_p3), 0   ;;  %p178_p4 = scmp.lt.s32.totalorder (!%p141_p3), %s350_s9, 1 }
   0x7   : > { %144 = sbr.rel (%p141_p3) target bundleno = 139 (0x8b), region = 28  ;;  %335 = vset.pattern.permute.xlu0 (!%p141_p3), %v360_v1 }
   0x8   : > { %196 = vperm.xlu0 (!%p141_p3), %335, %v193_v0  }
   0xe   : > { %s408_s9 = smov (!%p178_p4, %s350_s9), 1 }
   0xf   : > { %s306_s15 = sshll.u32 %s408_s9, 3 }
  0x10   : > { %s183_s18 = scalar_lea.vmem %s401_s1, %s306_s15  ;;  %s191_s21 = scalar_lea.vmem %s402_s2, %s306_s15 }
  0x11   : > { %v192_v2 = vld [vmem:[%s183_s18] sm:$0xff] }
  0x87   : > { %v197_v3 = vpop.permute.xlu0 %196 }
  0x88   : > { %v199_v4 = vmul.f32 %v197_v3, %v192_v2 }
  0x8a   : > { %200 = vst [vmem:[%s191_s21] sm:$0xff] %v199_v4 }
  0x8b PF: > { %s12_s11 = sadd.s32 1, %s358_s11   ;;  %s403_s9 = smov %s354_s10 }
  0x8c   : > { %p9_p5 = scmp.ge.s32.totalorder %s12_s11, 4   ;;  %s404_s10 = smov %s406_s12 }
  0x8e   :  { %11 = sbr.rel (!%p9_p5) target bundleno = 2 (0x2), region = 61 }

</bundles_post_ra>
